<compile_context>
chip_gen: v7x
topology: tpu7x:2x2x1
jax: 0.10.0
libtpu: 0.0.40
codegen_flags: <defaults>
</compile_context>

<pallas_src>
import jax
import jax.numpy as jnp
from jax import lax
from jax.experimental import pallas as pl
from jax.experimental.pallas import tpu as pltpu


def baseline_kernel(h_ref, w_ref, b_ref, o_ref):
    # h_ref: (TB, K) VMEM   w_ref: (N, K) VMEM   b_ref: (N,) SMEM   o_ref: (N, TB) VMEM
    # y^T = W @ h^T, computed without materializing any transpose: contract the K
    # (last) dim of both operands -> (N, TB), batch on lanes (lane-dense output).
    y = lax.dot_general(
        w_ref[...], h_ref[...],
        dimension_numbers=(((1,), (1,)), ((), ())),
        preferred_element_type=jnp.float32,
    )
    n_out = o_ref.shape[0]
    for j in range(n_out):  # static unroll; output_size is tiny (1 for this module)
        row = jnp.maximum(y[j:j + 1, :] + b_ref[j], 0.0)
        o_ref[j:j + 1, :] = row.astype(o_ref.dtype)


def baseline_network(h_t, weight, bias, *, row_block=512):
    """Forward pass: relu(h_t @ weight.T + bias).

    Args:
        h_t:    (B, input_size) float32 — flatten batch*time rows into B before
                calling to amortize the pallas_call over many rows.
        weight: (output_size, input_size) float32  (PyTorch nn.Linear layout,
                passed as-is: no wrapper-side transpose).
        bias:   (output_size,) float32
    Returns:
        (B, output_size) float32
    """
    B, K = h_t.shape
    N, K2 = weight.shape
    assert K == K2 and bias.shape == (N,)

    # Row tile: single full block for small B, otherwise a 128-multiple tile so
    # the (N, TB) output block satisfies the (8, 128) layout rules and stores
    # stay lane-dense. row_block must be a multiple of 128 when B > row_block.
    TB = B if B <= row_block else row_block
    grid = (pl.cdiv(B, TB),)

    out_t = pl.pallas_call(
        baseline_kernel,
        out_shape=jax.ShapeDtypeStruct((N, B), h_t.dtype),
        grid_spec=pltpu.PrefetchScalarGridSpec(
            num_scalar_prefetch=0,
            grid=grid,
            in_specs=[
                # Row tile of activations; tiled along the parallel grid axis.
                pl.BlockSpec((TB, K), lambda i: (i, 0)),
                # Whole weight in its native (N, K) layout, resident across steps.
                pl.BlockSpec((N, K), lambda i: (0, 0)),
                # Bias scalars in SMEM: no padded VMEM tile, no extra DMA pair.
                pl.BlockSpec(memory_space=pltpu.MemorySpace.SMEM),
            ],
            out_specs=pl.BlockSpec((N, TB), lambda i: (0, i)),
        ),
        compiler_params=pltpu.CompilerParams(
            # Row-tile axis is independent -> pipelined and shardable across the
            # 2 TensorCores on v7x.
            dimension_semantics=("parallel",),
        ),
    )(h_t, weight, bias)

    # Kernel emits (N, B); present the module's (B, N) view.
    if N == 1:
        return out_t.reshape(B, N)  # free re-view, no data movement
    return out_t.T
    # TODO(synk): for large output_size, tile N as well and emit (B, N) directly.


def init_linear_params(key, input_size, output_size):
    """Deterministic init mimicking nn.Linear's uniform(-1/sqrt(in), 1/sqrt(in))."""
    kw, kb = jax.random.split(key)
    bound = 1.0 / jnp.sqrt(jnp.float32(input_size))
    weight = jax.random.uniform(
        kw, (output_size, input_size), jnp.float32, minval=-bound, maxval=bound
    )
    bias = jax.random.uniform(
        kb, (output_size,), jnp.float32, minval=-bound, maxval=bound
    )
    return weight, bias


if __name__ == "__main__":
    key = jax.random.PRNGKey(0)
    k_h, k_p, k_h2, k_p2 = jax.random.split(key, 4)

    # Primary case: many rows (batch * timesteps flattened) in one call so the
    # pallas_call cost is amortized across a row-tiled parallel grid.
    B, input_size, output_size = 256, 128, 1
    h_t = jax.random.normal(k_h, (B, input_size), jnp.float32)
    weight, bias = init_linear_params(k_p, input_size, output_size)
    b_t = jax.block_until_ready(baseline_network(h_t, weight, bias, row_block=128))
    ref = jnp.maximum(h_t @ weight.T + bias, 0.0)
    assert b_t.shape == (B, output_size)
    assert jnp.allclose(b_t, ref, atol=1e-4, rtol=1e-4)

    # Tiny case matching the original module-sized example (B=2, in=32, out=1):
    # single full-array block, still lane-dense on the batch dimension.
    B2, in2, out2 = 2, 32, 1
    h2 = jax.random.normal(k_h2, (B2, in2), jnp.float32)
    w2, bi2 = init_linear_params(k_p2, in2, out2)
    b2 = jax.block_until_ready(baseline_network(h2, w2, bi2))
    ref2 = jnp.maximum(h2 @ w2.T + bi2, 0.0)
    assert b2.shape == (B2, out2)
    assert jnp.allclose(b2, ref2, atol=1e-4, rtol=1e-4)

    print("KERNEL_OK")
</pallas_src>

<mosaic_0001>
module attributes {stable_mosaic.version = 11 : i64} {
  func.func @baseline_kernel(%arg0: i32, %arg1: memref<128x128xf32, #tpu.memory_space<vmem>>, %arg2: memref<1x128xf32, #tpu.memory_space<vmem>>, %arg3: memref<1xf32, #tpu.memory_space<smem>>, %arg4: memref<1x128xf32, #tpu.memory_space<vmem>>) attributes {dimension_semantics = [#tpu.dimension_semantics<parallel>], iteration_bounds = array<i64: 2>, scalar_prefetch = 0 : i64, scratch_operands = 0 : i64, tpu.core_type = #tpu.core_type<tc>, window_params = [{transform_indices = @transform_0, window_bounds = array<i64: 128, 128>}, {pipeline_mode = #tpu.pipeline_mode<synchronous>, transform_indices = @transform_1, window_bounds = array<i64: 1, 128>}, {transform_indices = @transform_2, window_bounds = array<i64: 1>}, {transform_indices = @transform_3, window_bounds = array<i64: 1, 128>}]} {
    %c0 = arith.constant 0 : index
    %c0_0 = arith.constant 0 : index
    %0 = vector.load %arg2[%c0, %c0_0] : memref<1x128xf32, #tpu.memory_space<vmem>>, vector<1x128xf32>
    %c0_1 = arith.constant 0 : index
    %c0_2 = arith.constant 0 : index
    %1 = vector.load %arg1[%c0_1, %c0_2] : memref<128x128xf32, #tpu.memory_space<vmem>>, vector<128x128xf32>
    %cst = arith.constant dense<0.000000e+00> : vector<1x128xf32>
    %2 = tpu.matmul %0, %1, %cst {dimension_numbers = #tpu.dot_dimension_numbers<[1], [1], [0], [0], [0, 0, 1, 0], [], []>} : vector<1x128xf32>, vector<128x128xf32>, vector<1x128xf32> -> vector<1x128xf32>
    %c0_3 = arith.constant 0 : index
    %3 = memref.load %arg3[%c0_3] : memref<1xf32, #tpu.memory_space<smem>>
    %4 = vector.broadcast %3 : f32 to vector<1x128xf32>
    %5 = arith.addf %2, %4 : vector<1x128xf32>
    %cst_4 = arith.constant 0.000000e+00 : f32
    %6 = vector.broadcast %cst_4 : f32 to vector<1x128xf32>
    %7 = arith.maximumf %5, %6 : vector<1x128xf32>
    %c0_5 = arith.constant 0 : index
    %c0_6 = arith.constant 0 : index
    %8 = vector.load %arg4[%c0_5, %c0_6] : memref<1x128xf32, #tpu.memory_space<vmem>>, vector<1x128xf32>
    tpu.vector_store %arg4[%c0_5, %c0_6], %7 {strides = array<i32>} : memref<1x128xf32, #tpu.memory_space<vmem>>, vector<1x128xf32>,
    return
  }
  func.func @transform_0(%arg0: i32) -> (i32, i32) {
    %c0_i32 = arith.constant 0 : i32
    %c0_i32_0 = arith.constant 0 : i32
    return %arg0, %c0_i32 : i32, i32
  }
  func.func @transform_1(%arg0: i32) -> (i32, i32) {
    %c0_i32 = arith.constant 0 : i32
    %c0_i32_0 = arith.constant 0 : i32
    %c0_i32_1 = arith.constant 0 : i32
    return %c0_i32, %c0_i32_0 : i32, i32
  }
  func.func @transform_2(%arg0: i32) -> i32 {
    %c0_i32 = arith.constant 0 : i32
    %c0_i32_0 = arith.constant 0 : i32
    return %c0_i32 : i32
  }
  func.func @transform_3(%arg0: i32) -> (i32, i32) {
    %c0_i32 = arith.constant 0 : i32
    %c0_i32_0 = arith.constant 0 : i32
    return %c0_i32, %arg0 : i32, i32
  }
}

</mosaic_0001>

<bundles_post_ra>
// kernel: tpu_custom_call.1
= control target key start
LH: loop header
LB: loop body
LE: loop exit
PB: predicated region body
PF: predicated region fallthrough
CT: control target
= control target key end

     0   :  { %s809_s0 = inlined_call_operand.hbm [shape: f32[256,128], index: 0, kind: input, shape index: {}]   ;;  %s810_s1 = inlined_call_operand.vmem [shape: f32[1,128], index: 1, kind: input, shape index: {}]   ;;  %s811_s2 = inlined_call_operand.<no memory space> [shape: f32[1], index: 2, kind: input, shape index: {}]   ;;  %s812_s3 = inlined_call_operand.hbm [shape: f32[1,256], index: 3, kind: output, shape index: {}]  }
   0x1   :  { %8 = sst [smem:[#allocation2]] %s811_s2 }
   0x2   :  { %9 = vsyncpa [#allocation4], 0 }
   0x3   :  { %11 = vsyncpa [#allocation4 + $0x1], 0 }
   0x4   :  { %12 = vsyncpa [#allocation5], 0 }
   0x5   :  { %14 = vsyncpa [#allocation5 + $0x1], 0  ;;  %s627_s14 = smov 0   ;;  %s629_s15 = smov 0  }
   0x6   :  { %s631_s16 = smov 0   ;;  %s633_s17 = smov 0  }
   0x7 LB: > { %s648_s2 = sadd.s32 4294967295, %s595_s17   ;;  %s360_s18 = sadd.s32 4294967294, %s595_s17   ;;  %s595_s17 = sphi %s633_s17, %s825_s17   ;;  %s591_s16 = sphi %s631_s16, %s824_s16   ;;  %s587_s15 = sphi %s629_s15, %s823_s15   ;;  %s583_s14 = sphi %s627_s14, %s822_s14  }
   0x8   : > { %s652_s19 = sadd.s32 1, %s595_s17   ;;  %s27_s20 = sadd.s32 1, %s591_s16 }
   0x9   : > { %s24_s21 = ssub.s32 %s595_s17, %s652_s19  ;;  %p34_p0 = scmp.ne.s32.totalorder %s591_s16, %s587_s15 }
   0xa   : > { %p25_p1 = scmp.eq.s32.totalorder %s24_s21, 0  ;;  %p35_p2 = scmp.eq.s32.totalorder %s595_s17, 0 }
   0xb   : > { %p40_p3 = scmp.ne.s32.totalorder %s587_s15, %s583_s14  ;;  %p41_p4 = scmp.eq.s32.totalorder %s648_s2, 0 }
   0xc   : > { %s664_s22 = scalar_select %p25_p1, %s591_s16, %s27_s20  }
   0xd   : > { %p666_p5 = por %p35_p2, %p34_p0  ;;  %p670_p6 = por %p41_p4, %p40_p3 }
   0xe   : > { %p106_p7 = scmp.eq.s32.totalorder %s648_s2, 1  ;;  %p112_p8 = scmp.eq.s32.totalorder %s360_s18, 1 }
   0xf   : > { %p460_p10 = scmp.lt.s32.totalorder %s595_s17, 2  ;;  %s138_s27 = sand.u32 1, %s591_s16  }
  0x10   : > { %p677_p11 = por %p106_p7, %p34_p0  ;;  %p681_p12 = por %p112_p8, %p40_p3 }
  0x11   : > { %s371_s28 = sshll.u32 %s595_s17, 11  ;;  %s363_s29 = sshll.u32 %s138_s27, 7 }
  0x12   : > { %s816_s25 = scalar_select %p677_p11, 1, 0 }
  0x13   : > { %s817_s26 = scalar_select %p681_p12, 1, 0 }
  0x14   : > { %s690_s5 = scalar_lea.hbm %s809_s0, %s371_s28  ;;  %s142_s6 = scalar_lea.vmem [#allocation3], %s363_s29 }
  0x15   : > { %s149_s7 = sshll.u32 %s142_s6, 4  ;;  %p694_p13 = pnand %p460_p10, %p666_p5  ;;  %s698_s7 = int_to_ptr.vmem [resolvable:$true] %s149_s7 }
  0x16   : > { %s700_s9 = scalar_lea.sflag [#allocation4], %s138_s27  ;;  %s499_s10 = scalar_lea.hbm %s690_s5, 2048 }
  0x17   : > { %p500_p0 = scmp.ne.s32.totalorder %s690_s5, %s499_s10  ;;  %p501_p1 = pneg %p694_p13 }
  0x18   : > { %s504_s13 = scalar_lea.hbm %s809_s0, 4096  ;;  %p505_p4 = scmp.lt.u32.totalorder %s690_s5, %s809_s0 }
  0x19   : > { %p502_p2 = pnand %p501_p1, %p500_p0  ;;  %p506_p5 = scmp.lt.u32.totalorder %s504_s13, %s499_s10 }
  0x1a   : > { %p508_p8 = scmp.lt.u32.totalorder %s499_s10, %s690_s5 }
  0x1b   : > { %p503_p3 = pneg %p502_p2  ;;  %p507_p7 = por %p506_p5, %p505_p4 }
  0x1d   : > { %p509_p10 = por %p508_p8, %p507_p7 }
  0x1f   : > { %p510_p9 = pnand %p509_p10, %p503_p3 }
  0x21   : > { %513 = shalt.err (!%p510_p9)
}
  0x22   : > { %s514_s21 = scalar_lea.vmem %s698_s7, 2048  ;;  %s597_s23 = smov [#allocation3]  }
  0x23   : > { %p515_p0 = scmp.ne.s32.totalorder %s698_s7, %s514_s21  ;;  %s519_s27 = sshll.u32 %s597_s23, 4  ;;  %s520_s27 = int_to_ptr.vmem [resolvable:$false] %s519_s27 }
  0x24   : > { %s521_s28 = scalar_lea.vmem %s520_s27, 4096  ;;  %p522_p11 = scmp.lt.s32.totalorder %s698_s7, %s520_s27 }
  0x25   : > { %p517_p2 = pnand %p515_p0, %p501_p1  ;;  %p523_p4 = scmp.lt.s32.totalorder %s521_s28, %s514_s21 }
  0x27   : > { %p518_p12 = pneg %p517_p2  ;;  %p524_p5 = por %p523_p4, %p522_p11 }
  0x29   : > { %p525_p7 = pnand %p524_p5, %p518_p12 }
  0x2b   : > { %528 = shalt.err (!%p525_p7)
}
  0x2c   : > { %s598_s29 = smov 128   ;;  %s599_s30 = smov 8  }
  0x2d   : > { %455 = dma.hbm_to_vmem [thread:$0]  (!%p694_p13), %s690_s5, 2048, %s698_s7, %s700_s9, %s598_s29, %s598_s29, %s599_s30  }
  0x2e   : > { %p366_p9 = scmp.ge.s32.totalorder %s595_s17, 1  ;;  %p157_p1 = scmp.lt.s32.totalorder %s595_s17, 3 }
  0x30   : > { %p158_p3 = pnand %p366_p9, %p157_p1 }
  0x31   : > { %s731_s4 = sand.u32 (!%p158_p3), 1, %s587_s15  }
  0x32   : > { %161 = sbr.rel (%p158_p3) target bundleno = 354 (0x162), region = 32  ;;  %s367_s6 = sshll.u32 (!%p158_p3), %s731_s4, 7 }
  0x33   : > { %s164_s10 = scalar_lea.sflag (!%p158_p3), [#allocation4], %s731_s4  ;;  %s735_s11 = scalar_lea.vmem (!%p158_p3), [#allocation3], %s367_s6 }
  0x39   : > { %574 = dma.done.wait (%p670_p6), %s164_s10, 2048  }
  0x3a   : > { %576 = vsyncadd (%p670_p6), %s164_s10, 4294965248  ;;  %v600_v0 = vmov 0.0|0.0   ;;  %vm601_vm0 = vmmov 0   ;;  %v602_v1 = vmov 0.0   ;;  %v191_v2 = vld [vmem:[%s735_s11] sm:$0xff]  ;;  %v192_v3 = vld [vmem:[%s735_s11 + $0x8] sm:$0xff] }
  0x3b   : > { %424 = vmatprep.subr.bf16.mxu0 %v600_v0  ;;  %421 = vmatprep.mubr.msk.f32.mxu0 %vm601_vm0, %v602_v1  ;;  %v425_v4 = vpack.c.bf16 %v192_v3, %v191_v2  ;;  %v193_v5 = vld [vmem:[%s735_s11 + $0x10] sm:$0xff]  ;;  %v194_v6 = vld [vmem:[%s735_s11 + $0x18] sm:$0xff]  ;;  %v195_v8 = vld [vmem:[%s735_s11 + $0x20] sm:$0xff]  ;;  %s207_s7 = sld [smem:[#allocation2]]  ;;  %s368_s8 = sshll.u32 %s648_s2, 4 }
  0x3c   : > { %v428_v7 = vpack.c.bf16 %v194_v6, %v193_v5  ;;  %v196_v9 = vld [vmem:[%s735_s11 + $0x28] sm:$0xff]  ;;  %v197_v11 = vld [vmem:[%s735_s11 + $0x30] sm:$0xff]  ;;  %v198_v12 = vld [vmem:[%s735_s11 + $0x38] sm:$0xff]  ;;  %s188_s9 = scalar_lea.vmem [#allocation6], %s731_s4  ;;  %s765_s20 = scalar_lea.hbm %s812_s3, %s368_s8 }
  0x3d   : > { %426 = vmatpush3.bf16.xpose.msra.mxu0 %v425_v4  ;;  %v431_v10 = vpack.c.bf16 %v196_v9, %v195_v8  ;;  %v434_v13 = vpack.c.bf16 %v198_v12, %v197_v11  ;;  %v199_v14 = vld [vmem:[%s735_s11 + $0x40] sm:$0xff]  ;;  %v200_v15 = vld [vmem:[%s735_s11 + $0x48] sm:$0xff]  ;;  %v201_v17 = vld [vmem:[%s735_s11 + $0x50] sm:$0xff]  ;;  %s294_s12 = sshll.u32 %s188_s9, 4  ;;  %s282_s21 = scalar_lea.sflag [#allocation5], %s731_s4  ;;  %s767_s12 = int_to_ptr.vmem [resolvable:$true] %s294_s12 }
  0x3e   : > { %427 = vmatprep.subr.bf16.mxu0 %v600_v0  ;;  %v437_v16 = vpack.c.bf16 %v200_v15, %v199_v14  ;;  %v202_v18 = vld [vmem:[%s735_s11 + $0x58] sm:$0xff]  ;;  %v203_v20 = vld [vmem:[%s735_s11 + $0x60] sm:$0xff]  ;;  %v204_v21 = vld [vmem:[%s735_s11 + $0x68] sm:$0xff]  ;;  %s529_s23 = scalar_lea.vmem %s767_s12, 16  ;;  %p819_p11 = scmp.ne.s32.totalorder %s816_s25, 0 }
  0x3f   : > { %v440_v19 = vpack.c.bf16 %v202_v18, %v201_v17  ;;  %v443_v22 = vpack.c.bf16 %v204_v21, %v203_v20  ;;  %v205_v23 = vld [vmem:[%s735_s11 + $0x70] sm:$0xff]  ;;  %v206_v24 = vld [vmem:[%s735_s11 + $0x78] sm:$0xff]  ;;  %v190_v26 = vld [vmem:[%s810_s1] sm:$0x1]  ;;  %p530_p6 = scmp.ne.s32.totalorder %s767_s12, %s529_s23  ;;  %s603_s2 = smov [#allocation6]  }
  0x40   : > { %v446_v25 = vpack.c.bf16 %v206_v24, %v205_v23  ;;  %s533_s27 = sshll.u32 %s603_s2, 4  ;;  %s534_s27 = int_to_ptr.vmem [resolvable:$false] %s533_s27 }
  0x41   : > { %v208_v27 = vstv %s207_s7  ;;  %p531_p12 = pnand %p530_p6, %p819_p11  ;;  %s535_s28 = scalar_lea.vmem %s534_s27, 32 }
  0x42   : > { %p536_p8 = scmp.lt.s32.totalorder %s767_s12, %s534_s27  ;;  %p537_p10 = scmp.lt.s32.totalorder %s535_s28, %s529_s23 }
  0x43   : > { %p532_p13 = pneg %p531_p12 }
  0x44   : > { %p538_p0 = por %p537_p10, %p536_p8 }
  0x45   : > { %429 = vmatpush3.bf16.xpose.msra.mxu0 %v428_v7 }
  0x46   : > { %430 = vmatprep.subr.bf16.mxu0 %v600_v0  ;;  %p539_p2 = pnand %p538_p0, %p532_p13 }
  0x4d   : > { %432 = vmatpush3.bf16.xpose.msra.mxu0 %v431_v10 }
  0x4e   : > { %433 = vmatprep.subr.bf16.mxu0 %v600_v0 }
  0x55   : > { %435 = vmatpush3.bf16.xpose.msra.mxu0 %v434_v13 }
  0x56   : > { %436 = vmatprep.subr.bf16.mxu0 %v600_v0 }
  0x5d   : > { %438 = vmatpush3.bf16.xpose.msra.mxu0 %v437_v16 }
  0x5e   : > { %439 = vmatprep.subr.bf16.mxu0 %v600_v0 }
  0x65   : > { %441 = vmatpush3.bf16.xpose.msra.mxu0 %v440_v19 }
  0x66   : > { %442 = vmatprep.subr.bf16.mxu0 %v600_v0 }
  0x6d   : > { %444 = vmatpush3.bf16.xpose.msra.mxu0 %v443_v22 }
  0x6e   : > { %445 = vmatprep.subr.bf16.mxu0 %v600_v0 }
  0x75   : > { %447 = vmatpush3.bf16.xpose.msra.mxu0 %v446_v25 }
  0x7c   : > { %422 = vmatmul.mubr.f32.vlgmr.msra.gmra.mrb[0].mxu0 %v190_v26 }
 0x14f   : > { %v275_v28 = vpop.f32.mrb[0].mxu0 }
 0x150   : > { %v276_v29 = vadd.f32 %v275_v28, %v208_v27  ;;  %v423_v30 = vpop.f32.mrb[1].mxu0 }
 0x152   : > { %v279_v31 = vmax.f32 %v276_v29, 0.0 }
 0x154   : > { %280 = vst [vmem:[%s188_s9] sm:$0x1] %v279_v31 }
 0x155   : > { %542 = shalt.err (!%p539_p2)
}
 0x156   : > { %s543_s29 = scalar_lea.hbm %s765_s20, 16  ;;  %s547_s6 = scalar_lea.hbm %s812_s3, 32 }
 0x157   : > { %p544_p4 = scmp.ne.s32.totalorder %s765_s20, %s543_s29  ;;  %p548_p9 = scmp.lt.u32.totalorder %s765_s20, %s812_s3 }
 0x158   : > { %p549_p1 = scmp.lt.u32.totalorder %s547_s6, %s543_s29  ;;  %p551_p6 = scmp.lt.u32.totalorder %s543_s29, %s765_s20 }
 0x159   : > { %p545_p5 = pnand %p544_p4, %p819_p11 }
 0x15a   : > { %p550_p3 = por %p549_p1, %p548_p9 }
 0x15b   : > { %p546_p7 = pneg %p545_p5 }
 0x15c   : > { %p552_p12 = por %p551_p6, %p550_p3 }
 0x15e   : > { %p553_p13 = pnand %p552_p12, %p546_p7 }
 0x160   : > { %556 = shalt.err (!%p553_p13)
}
 0x161   : > { %450 = dma.vmem_to_hbm [thread:$0]  (%p819_p11), %s767_s12, 16, %s765_s20, %s282_s21  }
 0x162 PF: > { %s306_s24 = sand.u32 1, %s583_s14   ;;  %p820_p8 = scmp.ne.s32.totalorder %s817_s26, 0 }
 0x163   : > { %p821_p10 = scmp.ge.s32.totalorder %s595_s17, 2  ;;  %s307_s5 = scalar_lea.sflag [#allocation5], %s306_s24 }
 0x165   : > { %p457_p0 = pnand %p821_p10, %p820_p8 }
 0x167   : > { %578 = dma.done.wait (!%p457_p0), %s307_s5, 16  }
 0x168   : > { %580 = vsyncadd (!%p457_p0), %s307_s5, 4294967280  ;;  %p17_p2 = scmp.ge.s32.totalorder %s652_s19, 4   ;;  %s822_s14 = smov %s587_s15 }
 0x169   : > { %s823_s15 = smov %s591_s16  ;;  %s824_s16 = smov %s664_s22 }
 0x16a   : > { %s825_s17 = smov %s652_s19  ;;  %19 = sbr.rel (!%p17_p2) target bundleno = 7 (0x7), region = 77 }
 0x171   :  { %311 = vsyncpa [#allocation4], 1 }
 0x172   :  { %313 = vsyncpa [#allocation4 + $0x1], 1 }
 0x173   :  { %314 = vsyncpa [#allocation5], 1 }
 0x174   :  { %316 = vsyncpa [#allocation5 + $0x1], 1 }

</bundles_post_ra>
